<compile_context>
chip_gen: v7x
topology: tpu7x:2x2x1
jax: 0.10.0
libtpu: 0.0.40
codegen_flags: <defaults>
</compile_context>

<pallas_src>
import math

import jax
import jax.numpy as jnp
from jax import lax
from jax.experimental import pallas as pl
from jax.experimental.pallas import tpu as pltpu


def _spec_embed_kernel(spec_ref, g_ref, b_ref, o_ref):
    # spec_ref: (tm, k)   folded spec rows (k spec scalars per lane-dense output row)
    # g_ref:    (k, kd)   kron(eye(k), weight_row), f32, resident
    # b_ref:    (1, kd)   bias tiled k times, f32, resident
    # o_ref:    (tm, kd)
    s = spec_ref[...].astype(jnp.float32)
    g = g_ref[...]
    b = b_ref[...]
    k = s.shape[1]
    if k == 1:
        # d_model is a multiple of 128: plain VPU broadcast multiply-add.
        out = s * g + b
    else:
        # Block-diagonal expansion on the (otherwise idle) MXU.
        out = jnp.dot(s, g,
                      preferred_element_type=jnp.float32,
                      precision=lax.Precision.HIGHEST) + b
    o_ref[...] = out.astype(o_ref.dtype)


def _sublane_multiple(dtype):
    return {4: 8, 2: 16, 1: 32}[jnp.dtype(dtype).itemsize]


def _choose_tile_rows(rows, k, kd, spec_dtype, out_dtype):
    out_sz = jnp.dtype(out_dtype).itemsize
    spec_sz = jnp.dtype(spec_dtype).itemsize
    align = max(_sublane_multiple(out_dtype), _sublane_multiple(spec_dtype))

    # VMEM footprint per folded row (the (tm, k) input block is lane-padded to >=128).
    bytes_per_row = kd * out_sz + max(k, 128) * spec_sz
    budget = 12 * 1024 * 1024                 # per buffer; ~24 MiB double-buffered
    tm = max(align, budget // bytes_per_row)

    # Keep >= ~8 grid steps when there is enough work (megacore sharding on v7x),
    # but never shrink a tile below ~2 MiB of output (per-step overhead amortization).
    min_rows = max(align, -(-(2 * 1024 * 1024) // (kd * out_sz)))
    target = -(-rows // 8)
    tm = min(tm, max(min_rows, target))
    tm = min(tm, rows)
    if tm < rows:
        tm = max(align, (tm // align) * align)
    return tm


def spec_embedding(spec, weight, bias, *, out_dtype=None):
    """spec: (B, N); weight: (d_model, 1); bias: (d_model,) -> (B, N, d_model)."""
    B, N = spec.shape
    d_model = weight.shape[0]
    out_dtype = spec.dtype if out_dtype is None else jnp.dtype(out_dtype)

    # Fold factor: kd = k * d_model = lcm(d_model, 128) is always lane-dense.
    k = 128 // math.gcd(d_model, 128)
    kd = k * d_model

    M = B * N
    M_pad = -(-M // k) * k
    spec_flat = spec.reshape(M)
    if M_pad != M:
        spec_flat = jnp.pad(spec_flat, (0, M_pad - M))
    rows = M_pad // k
    spec_folded = spec_flat.reshape(rows, k)

    # Resident operands: block-diagonal weight expansion + tiled bias (both f32).
    w_row = weight.reshape(1, d_model).astype(jnp.float32)
    g = jnp.kron(jnp.eye(k, dtype=jnp.float32), w_row)                       # (k, kd)
    b_row = jnp.tile(bias.reshape(1, d_model).astype(jnp.float32), (1, k))   # (1, kd)

    tm = _choose_tile_rows(rows, k, kd, spec.dtype, out_dtype)
    grid = (pl.cdiv(rows, tm),)

    out_folded = pl.pallas_call(
        _spec_embed_kernel,
        out_shape=jax.ShapeDtypeStruct((rows, kd), out_dtype),
        grid_spec=pltpu.PrefetchScalarGridSpec(
            num_scalar_prefetch=0,
            grid=grid,
            in_specs=[
                pl.BlockSpec((tm, k), lambda i: (i, 0)),    # folded spec rows
                pl.BlockSpec((k, kd), lambda i: (0, 0)),    # block-diag weight (resident)
                pl.BlockSpec((1, kd), lambda i: (0, 0)),    # tiled bias (resident)
            ],
            out_specs=pl.BlockSpec((tm, kd), lambda i: (i, 0)),
        ),
        compiler_params=pltpu.CompilerParams(
            dimension_semantics=("parallel",),     # row axis shards across TCs on v7x
            vmem_limit_bytes=32 * 1024 * 1024,     # safe on v5e/v6e/v7x; tiles sized to fit
        ),
    )(spec_folded, g, b_row)

    out = out_folded.reshape(M_pad, d_model)
    if M_pad != M:
        out = out[:M]
    return out.reshape(B, N, d_model)


def spec_embedding_ref(spec, weight, bias):
    # Pure-JAX reference of the PyTorch forward.
    B, N = spec.shape
    out = spec.reshape(B * N, 1) @ weight.T + bias   # (B*N, d_model)
    return out.reshape(B, N, weight.shape[0])


if __name__ == "__main__":
    key = jax.random.PRNGKey(0)

    cases = [
        dict(batch=2, n=8, d_model=32),    # k=4 fold, MXU expansion path
        dict(batch=2, n=8, d_model=256),   # k=1, pure VPU broadcast path
        dict(batch=3, n=5, d_model=48),    # k=8 fold + row padding (M=15)
    ]
    for c in cases:
        key, k_spec, k_w, k_b = jax.random.split(key, 4)
        d_model = c["d_model"]
        # nn.Linear(1, d_model) parameter shapes: weight (d_model, 1), bias (d_model,)
        weight = jax.random.uniform(k_w, (d_model, 1), jnp.float32, -1.0, 1.0)
        bias = jax.random.uniform(k_b, (d_model,), jnp.float32, -1.0, 1.0)
        spec = jax.random.normal(k_spec, (c["batch"], c["n"]), jnp.float32)

        out = jax.block_until_ready(spec_embedding(spec, weight, bias))
        ref = spec_embedding_ref(spec, weight, bias)
        assert out.shape == (c["batch"], c["n"], d_model), c
        assert jnp.allclose(out, ref, atol=1e-5, rtol=1e-5), c

    print("KERNEL_OK")
</pallas_src>

<mosaic_0001>
module attributes {stable_mosaic.version = 11 : i64} {
  func.func @_spec_embed_kernel(%arg0: i32, %arg1: memref<4x4xf32, #tpu.memory_space<vmem>>, %arg2: memref<4x128xf32, #tpu.memory_space<vmem>>, %arg3: memref<1x128xf32, #tpu.memory_space<vmem>>, %arg4: memref<4x128xf32, #tpu.memory_space<vmem>>) attributes {dimension_semantics = [#tpu.dimension_semantics<parallel>], iteration_bounds = array<i64: 1>, scalar_prefetch = 0 : i64, scratch_operands = 0 : i64, tpu.core_type = #tpu.core_type<tc>, window_params = [{transform_indices = @transform_0, window_bounds = array<i64: 4, 4>}, {pipeline_mode = #tpu.pipeline_mode<synchronous>, transform_indices = @transform_1, window_bounds = array<i64: 4, 128>}, {pipeline_mode = #tpu.pipeline_mode<synchronous>, transform_indices = @transform_2, window_bounds = array<i64: 1, 128>}, {transform_indices = @transform_3, window_bounds = array<i64: 4, 128>}]} {
    %c0 = arith.constant 0 : index
    %c0_0 = arith.constant 0 : index
    %0 = vector.load %arg1[%c0, %c0_0] : memref<4x4xf32, #tpu.memory_space<vmem>>, vector<4x4xf32>
    %c0_1 = arith.constant 0 : index
    %c0_2 = arith.constant 0 : index
    %1 = vector.load %arg2[%c0_1, %c0_2] : memref<4x128xf32, #tpu.memory_space<vmem>>, vector<4x128xf32>
    %c0_3 = arith.constant 0 : index
    %c0_4 = arith.constant 0 : index
    %2 = vector.load %arg3[%c0_3, %c0_4] : memref<1x128xf32, #tpu.memory_space<vmem>>, vector<1x128xf32>
    %cst = arith.constant dense<0.000000e+00> : vector<4x128xf32>
    %3 = tpu.matmul %0, %1, %cst {dimension_numbers = #tpu.dot_dimension_numbers<[1], [0], [0], [1], [0, 0, 1, 1], [], []>, precision = #tpu.contract_precision<fp32>} : vector<4x4xf32>, vector<4x128xf32>, vector<4x128xf32> -> vector<4x128xf32>
    %4 = vector.broadcast %2 : vector<1x128xf32> to vector<4x128xf32>
    %5 = arith.addf %3, %4 : vector<4x128xf32>
    %c0_5 = arith.constant 0 : index
    %c0_6 = arith.constant 0 : index
    %6 = vector.load %arg4[%c0_5, %c0_6] : memref<4x128xf32, #tpu.memory_space<vmem>>, vector<4x128xf32>
    tpu.vector_store %arg4[%c0_5, %c0_6], %5 {strides = array<i32>} : memref<4x128xf32, #tpu.memory_space<vmem>>, vector<4x128xf32>,
    return
  }
  func.func @transform_0(%arg0: i32) -> (i32, i32) {
    %c0_i32 = arith.constant 0 : i32
    %c0_i32_0 = arith.constant 0 : i32
    return %arg0, %c0_i32 : i32, i32
  }
  func.func @transform_1(%arg0: i32) -> (i32, i32) {
    %c0_i32 = arith.constant 0 : i32
    %c0_i32_0 = arith.constant 0 : i32
    %c0_i32_1 = arith.constant 0 : i32
    return %c0_i32, %c0_i32_0 : i32, i32
  }
  func.func @transform_2(%arg0: i32) -> (i32, i32) {
    %c0_i32 = arith.constant 0 : i32
    %c0_i32_0 = arith.constant 0 : i32
    %c0_i32_1 = arith.constant 0 : i32
    return %c0_i32, %c0_i32_0 : i32, i32
  }
  func.func @transform_3(%arg0: i32) -> (i32, i32) {
    %c0_i32 = arith.constant 0 : i32
    %c0_i32_0 = arith.constant 0 : i32
    return %arg0, %c0_i32 : i32, i32
  }
}

</mosaic_0001>

<bundles_post_ra>
// kernel: tpu_custom_call.1
= control target key start
LH: loop header
LB: loop body
LE: loop exit
PB: predicated region body
PF: predicated region fallthrough
CT: control target
= control target key end

     0   :  { %8 = vsyncpa [#allocation3], 0  ;;  %s719_s0 = inlined_call_operand.hbm [shape: f32[4,4], index: 0, kind: input, shape index: {}]   ;;  %s720_s1 = inlined_call_operand.hbm [shape: f32[4,128], index: 1, kind: input, shape index: {}]   ;;  %s721_s2 = inlined_call_operand.vmem [shape: f32[1,128], index: 2, kind: input, shape index: {}]   ;;  %s722_s3 = inlined_call_operand.hbm [shape: f32[4,128], index: 3, kind: output, shape index: {}]  }
   0x1   :  { %9 = vsyncpa [#allocation6], 0 }
   0x2   :  { %10 = vsyncpa [#allocation4], 0  ;;  %s649_s12 = smov [#allocation2]   ;;  %s650_s14 = smov [#allocation5]  }
   0x3   :  { %s17_s13 = sshll.u32 %s649_s12, 4  ;;  %s27_s15 = sshll.u32 %s650_s14, 4  ;;  %s18_s13 = int_to_ptr.vmem [resolvable:$true] %s17_s13  ;;  %s28_s15 = int_to_ptr.vmem [resolvable:$true] %s27_s15 }
   0x4   :  { %s577_s18 = scalar_lea.hbm %s719_s0, 64 }
   0x5   :  { %p578_p0 = scmp.ne.s32.totalorder %s719_s0, %s577_s18  ;;  %p581_p1 = scmp.lt.u32.totalorder %s577_s18, %s719_s0 }
   0x7   :  { %p583_p2 = pnand %p581_p1, %p578_p0 }
   0x9   :  { %586 = shalt.err (!%p583_p2)
}
   0xa   :  { %s587_s23 = scalar_lea.vmem %s18_s13, 64  ;;  %p592_p4 = scmp.lt.s32.totalorder %s18_s13, %s18_s13 }
   0xb   :  { %p588_p3 = scmp.ne.s32.totalorder %s18_s13, %s587_s23  ;;  %p593_p5 = scmp.lt.s32.totalorder %s587_s23, %s587_s23 }
   0xd   :  { %p594_p6 = por %p593_p5, %p592_p4 }
   0xf   :  { %p595_p7 = pnand %p594_p6, %p588_p3 }
  0x11   :  { %598 = shalt.err (!%p595_p7)
}
  0x12   :  { %20 = dma.hbm_to_vmem [thread:$0]  %s719_s0, 64, %s18_s13, [#allocation3]  }
  0x13   :  { %s599_s28 = scalar_lea.hbm %s720_s1, 64 }
  0x14   :  { %p600_p8 = scmp.ne.s32.totalorder %s720_s1, %s599_s28  ;;  %p603_p9 = scmp.lt.u32.totalorder %s599_s28, %s720_s1 }
  0x16   :  { %p605_p10 = pnand %p603_p9, %p600_p8 }
  0x18   :  { %608 = shalt.err (!%p605_p10)
}
  0x19   :  { %s609_s6 = scalar_lea.vmem %s28_s15, 64  ;;  %p614_p12 = scmp.lt.s32.totalorder %s28_s15, %s28_s15 }
  0x1a   :  { %p610_p11 = scmp.ne.s32.totalorder %s28_s15, %s609_s6  ;;  %p615_p13 = scmp.lt.s32.totalorder %s609_s6, %s609_s6 }
  0x1c   :  { %p616_p0 = por %p615_p13, %p614_p12 }
  0x1e   :  { %p617_p1 = pnand %p616_p0, %p610_p11 }
  0x20   :  { %620 = shalt.err (!%p617_p1)
}
  0x21   :  { %30 = dma.hbm_to_vmem [thread:$0]  %s720_s1, 64, %s28_s15, [#allocation6]  }
  0x22   :  { %643 = dma.done.wait [#allocation3], 64  }
  0x23   :  { %644 = vsyncadd [#allocation3], 4294967232 }
  0x24   :  { %645 = dma.done.wait [#allocation6], 64  }
  0x25   :  { %646 = vsyncadd [#allocation6], 4294967232  ;;  %v651_v0 = vmov 0.0   ;;  %vm652_vm0 = vmmov 0   ;;  %vm52_vm1 = vcmask 1043456   ;;  %vm48_vm2 = vcmask 31744  }
  0x26   :  { %547 = vmatprep.subr.mxu0 %v651_v0  ;;  %549 = vmatprep.mubr.msk.f32.mxu0 %vm652_vm0, %v651_v0  ;;  %v40_v1 = vld [vmem:[#allocation5] sm:$0xf]  ;;  %v39_v2 = vld [vmem:[#allocation2] sm:$0xf]  ;;  %s653_s9 = smov [#allocation7]  }
  0x27   :  { %532 = vmatprep.subr.mxu1 %v651_v0  ;;  %534 = vmatprep.mubr.msk.f32.mxu1 %vm652_vm0, %v651_v0  ;;  %v54_v3 = vsel %vm52_vm1, %v40_v1, 0  ;;  %v50_v4 = vsel %vm48_vm2, %v39_v2, 0  ;;  %v519_v17 = vld [vmem:[%s721_s2] ss:$0 sm:$0xff]  ;;  %s509_s10 = sshll.u32 %s653_s9, 4  ;;  %s510_s10 = int_to_ptr.vmem [resolvable:$true] %s509_s10 }
  0x28   :  { %v57_v5 = vand.u32 4294901760, %v54_v3  ;;  %v122_v6 = vand.u32 4294901760, %v50_v4  ;;  %s621_s11 = scalar_lea.vmem %s510_s10, 64  ;;  %p626_p3 = scmp.lt.s32.totalorder %s510_s10, %s510_s10 }
  0x29   :  { %p622_p2 = scmp.ne.s32.totalorder %s510_s10, %s621_s11  ;;  %p627_p4 = scmp.lt.s32.totalorder %s621_s11, %s621_s11 }
  0x2a   :  { %v134_v7 = vsub.f32 %v54_v3, %v57_v5  ;;  %548 = vmatpush3.msra.mxu0 %v57_v5  ;;  %v123_v8 = vsub.f32 %v50_v4, %v122_v6  ;;  %533 = vmatpush3.msra.mxu1 %v57_v5 }
  0x2b   :  { %537 = vmatprep.subr.mxu1 %v651_v0  ;;  %552 = vmatprep.subr.mxu0 %v651_v0  ;;  %p628_p5 = por %p627_p4, %p626_p3 }
  0x2c   :  { %v124_v9 = vand.u32 4294901760, %v123_v8  ;;  %v135_v10 = vand.u32 4294901760, %v134_v7 }
  0x2d   :  { %p629_p6 = pnand %p628_p5, %p622_p2 }
  0x2e   :  { %550 = vmatmul.mubr.f32.vlgmr.msra.gmra.mrb[0].mxu0 %v124_v9  ;;  %v125_v11 = vsub.f32 %v123_v8, %v124_v9  ;;  %v136_v12 = vsub.f32 %v134_v7, %v135_v10 }
  0x2f   :  { %553 = vmatpush3.msra.mxu0 %v135_v10  ;;  %554 = vmatprep.mubr.msk.f32.mxu0 %vm652_vm0, %v651_v0 }
  0x30   :  { %v126_v13 = vand.u32 4294901760, %v125_v11  ;;  %v137_v14 = vand.u32 4294901760, %v136_v12  ;;  %557 = vmatprep.subr.mxu0 %v651_v0 }
  0x32   :  { %535 = vmatmul.mubr.f32.vlgmr.msra.gmra.mrb[0].mxu1 %v126_v13 }
  0x33   :  { %538 = vmatpush3.msra.mxu1 %v137_v14  ;;  %539 = vmatprep.mubr.msk.f32.mxu1 %vm652_vm0, %v651_v0 }
  0x34   :  { %542 = vmatprep.subr.mxu1 %v651_v0 }
  0x36   :  { %555 = vmatmul.mubr.f32.vlgmr.msra.gmra.mrb[0].mxu0 %v122_v6 }
  0x37   :  { %558 = vmatpush3.msra.mxu0 %v57_v5  ;;  %559 = vmatprep.mubr.msk.f32.mxu0 %vm652_vm0, %v651_v0 }
  0x3a   :  { %540 = vmatmul.mubr.f32.vlgmr.msra.gmra.mrb[0].mxu1 %v122_v6 }
  0x3b   :  { %543 = vmatpush3.msra.mxu1 %v134_v7  ;;  %544 = vmatprep.mubr.msk.f32.mxu1 %vm652_vm0, %v651_v0 }
  0x3e   :  { %560 = vmatmul.mubr.f32.vlgmr.msra.gmra.mrb[0].mxu0 %v122_v6 }
  0x42   :  { %545 = vmatmul.mubr.f32.vlgmr.msra.gmra.mrb[0].mxu1 %v123_v8 }
 0x111   :  { %v498_v15 = vpop.f32.mrb[0].mxu0 }
 0x112   :  { %v561_v16 = vpop.f32.mrb[1].mxu0 }
 0x115   :  { %v278_v18 = vpop.f32.mrb[0].mxu1 }
 0x116   :  { %v562_v19 = vadd.f32 %v519_v17, %v278_v18  ;;  %v546_v20 = vpop.f32.mrb[1].mxu1 }
 0x118   :  { %v563_v21 = vadd.f32 %v562_v19, %v498_v15 }
 0x11a   :  { %502 = vst [vmem:[#allocation7] sm:$0xf] %v563_v21 }
 0x11b   :  { %632 = shalt.err (!%p629_p6)
}
 0x11c   :  { %s633_s14 = scalar_lea.hbm %s722_s3, 64 }
 0x11d   :  { %p634_p7 = scmp.ne.s32.totalorder %s722_s3, %s633_s14  ;;  %p637_p8 = scmp.lt.u32.totalorder %s633_s14, %s722_s3 }
 0x11f   :  { %p639_p9 = pnand %p637_p8, %p634_p7 }
 0x121   :  { %642 = shalt.err (!%p639_p9)
}
 0x122   :  { %512 = dma.vmem_to_hbm [thread:$0]  %s510_s10, 64, %s722_s3, [#allocation4]  }
 0x123   :  { %647 = dma.done.wait [#allocation4], 64  }
 0x124   :  { %648 = vsyncadd [#allocation4], 4294967232 }
 0x125   :  { %516 = vsyncpa [#allocation3], 1 }
 0x126   :  { %517 = vsyncpa [#allocation6], 1 }
 0x127   :  { %518 = vsyncpa [#allocation4], 1 }

</bundles_post_ra>
